<compile_context>
chip_gen: v6e
topology: v6e:2x2x1
jax: 0.10.0
libtpu: 0.0.40
codegen_flags: <defaults>
</compile_context>

<pallas_src>
import jax
import jax.numpy as jnp
from jax import lax
from jax.experimental import pallas as pl
from jax.experimental.pallas import tpu as pltpu

_LANE = 128


def _choose_tn(n, c, itemsize):
    """Pick a lane-dense batch tile size.

    Budget ~4 MiB per pipelined input buffer (x2 for double buffering), which
    leaves generous headroom even under v5e's 16 MiB scoped-VMEM default.
    """
    budget = 4 << 20
    max_tn = max(_LANE, budget // max(1, c * itemsize))
    max_tn = max(_LANE, (max_tn // _LANE) * _LANE)   # multiple of 128
    if n <= max_tn:
        return n          # single block; block_shape == full array is always legal
    return max_tn


def _make_wce_kernel(n_total, tn, num_classes):
    def kernel(pred_ref, target_ref, weight_ref, out_ref):
        # pred_ref:   (C, TN)  logits (any float dtype in HBM; cast here)
        # target_ref: (1, TN)  int32 class indices
        # weight_ref: (C, 1)   f32 class weights
        # out_ref:    (1, 1, 128) f32 -> lane 0 = partial num, lane 1 = partial den
        logits = pred_ref[...].astype(jnp.float32)           # (C, TN)
        tgt = target_ref[...]                                 # (1, TN)
        w = weight_ref[...].astype(jnp.float32)               # (C, 1)

        # numerically-stable log-softmax along the class (sublane) axis
        m = jnp.max(logits, axis=0, keepdims=True)            # (1, TN)
        z = logits - m
        lse = jnp.log(jnp.sum(jnp.exp(z), axis=0, keepdims=True))
        logp = z - lse                                         # (C, TN)

        if num_classes == 2:
            # binary case: pure lane-wise selects, no one-hot / class reduces
            is0 = (tgt == 0)                                   # (1, TN)
            nll = -jnp.where(is0, logp[0:1, :], logp[1:2, :])  # (1, TN)
            w_per = jnp.where(is0, w[0:1, :], w[1:2, :])       # (1, TN)
        else:
            classes = lax.broadcasted_iota(jnp.int32, logp.shape, 0)   # (C, TN)
            onehot = (classes == tgt).astype(jnp.float32)              # (C, TN)
            nll = -jnp.sum(onehot * logp, axis=0, keepdims=True)       # (1, TN)
            w_per = jnp.sum(onehot * w, axis=0, keepdims=True)         # (1, TN)

        # mask lanes of the (possibly OOB) remainder tile out of num and den;
        # jnp.where also stops any NaN/Inf from garbage OOB rows leaking in.
        tile_idx = pl.program_id(0)
        lane = lax.broadcasted_iota(jnp.int32, (1, tn), 1)
        valid = (tile_idx * tn + lane) < n_total
        num = jnp.sum(jnp.where(valid, w_per * nll, 0.0))      # scalar
        den = jnp.sum(jnp.where(valid, w_per, 0.0))            # scalar

        lane_id = lax.broadcasted_iota(jnp.int32, (1, 1, _LANE), 2)
        out_ref[...] = jnp.where(lane_id == 0, num,
                                 jnp.where(lane_id == 1, den, 0.0))

    return kernel


def rawnet2_loss(pred, target, weight, tn=None):
    """Weighted cross-entropy with 'mean' reduction, matching
    torch.nn.CrossEntropyLoss(weight=weight)(pred, target):
        sum_i w[t_i] * nll_i / sum_i w[t_i]
    pred: (N, C) float logits (f32 or bf16 — DMA'd in HBM dtype),
    target: (N,) integer class ids, weight: (C,) float.
    """
    n, c = pred.shape
    itemsize = jnp.dtype(pred.dtype).itemsize
    if tn is None:
        tn = _choose_tn(n, c, itemsize)
    num_tiles = (n + tn - 1) // tn

    # lane-dense layouts: batch on the lane axis
    pred_t = jnp.transpose(pred)                        # (C, N), keep HBM dtype
    target2d = target.astype(jnp.int32).reshape(1, n)   # (1, N)
    weight2d = weight.astype(jnp.float32).reshape(c, 1) # (C, 1)

    partials = pl.pallas_call(
        _make_wce_kernel(n, tn, c),
        out_shape=jax.ShapeDtypeStruct((num_tiles, 1, _LANE), jnp.float32),
        grid_spec=pltpu.PrefetchScalarGridSpec(
            num_scalar_prefetch=0,
            grid=(num_tiles,),
            in_specs=[
                pl.BlockSpec((c, tn), lambda i: (0, i)),   # logits tile, lane-dense
                pl.BlockSpec((1, tn), lambda i: (0, i)),   # targets tile, lane-dense
                pl.BlockSpec((c, 1), lambda i: (0, 0)),    # class weights (tiny)
            ],
            out_specs=pl.BlockSpec((1, 1, _LANE), lambda i: (i, 0, 0)),
        ),
        compiler_params=pltpu.CompilerParams(
            dimension_semantics=("parallel",)),            # tiles independent -> megacore
    )(pred_t, target2d, weight2d)

    num = jnp.sum(partials[:, 0, 0])
    den = jnp.sum(partials[:, 0, 1])
    return num / den


def _reference_loss(pred, target, weight):
    # pure-JAX reference of torch.nn.CrossEntropyLoss(weight=weight)(pred, target)
    logp = jax.nn.log_softmax(pred.astype(jnp.float32), axis=-1)
    nll = -jnp.take_along_axis(logp, target[:, None].astype(jnp.int32), axis=-1)[:, 0]
    w = weight[target]
    return jnp.sum(w * nll) / jnp.sum(w)


if __name__ == "__main__":
    key = jax.random.PRNGKey(0)
    k1, k2, k3, k4 = jax.random.split(key, 4)

    # RawNet2: binary spoof/bonafide logits, class weights as in RawNet2Loss([0.1, 0.9])
    weight = jnp.array([0.1, 0.9], dtype=jnp.float32)

    # 1) small shape matching the module's typical use
    N, C = 8, 2
    pred = jax.random.normal(k1, (N, C), dtype=jnp.float32)
    target = jax.random.randint(k2, (N,), 0, C, dtype=jnp.int32)
    loss = rawnet2_loss(pred, target, weight)
    jax.block_until_ready(loss)
    ref = _reference_loss(pred, target, weight)
    assert jnp.allclose(loss, ref, rtol=1e-5, atol=1e-5), (loss, ref)

    # 2) exercise the tiled path + remainder masking (N not a multiple of the tile)
    N2 = 300
    pred2 = jax.random.normal(k3, (N2, C), dtype=jnp.float32)
    target2 = jax.random.randint(k4, (N2,), 0, C, dtype=jnp.int32)
    loss2 = rawnet2_loss(pred2, target2, weight, tn=128)
    jax.block_until_ready(loss2)
    ref2 = _reference_loss(pred2, target2, weight)
    assert jnp.allclose(loss2, ref2, rtol=1e-5, atol=1e-5), (loss2, ref2)

    print("KERNEL_OK")
</pallas_src>

<mosaic_0001>
module attributes {stable_mosaic.version = 11 : i64} {
  func.func @kernel(%arg0: i32, %arg1: memref<2x8xf32, #tpu.memory_space<vmem>>, %arg2: memref<1x8xi32, #tpu.memory_space<vmem>>, %arg3: memref<2x1xf32, #tpu.memory_space<vmem>>, %arg4: memref<1x1x128xf32, #tpu.memory_space<vmem>>) attributes {dimension_semantics = [#tpu.dimension_semantics<parallel>], iteration_bounds = array<i64: 1>, scalar_prefetch = 0 : i64, scratch_operands = 0 : i64, tpu.core_type = #tpu.core_type<tc>, window_params = [{transform_indices = @transform_0, window_bounds = array<i64: 2, 8>}, {transform_indices = @transform_1, window_bounds = array<i64: 1, 8>}, {pipeline_mode = #tpu.pipeline_mode<synchronous>, transform_indices = @transform_2, window_bounds = array<i64: 2, 1>}, {transform_indices = @transform_3, window_bounds = array<i64: 1, 1, 128>}]} {
    %c0 = arith.constant 0 : index
    %c0_0 = arith.constant 0 : index
    %0 = vector.load %arg1[%c0, %c0_0] : memref<2x8xf32, #tpu.memory_space<vmem>>, vector<2x8xf32>
    %c0_1 = arith.constant 0 : index
    %c0_2 = arith.constant 0 : index
    %1 = vector.load %arg2[%c0_1, %c0_2] : memref<1x8xi32, #tpu.memory_space<vmem>>, vector<1x8xi32>
    %c0_3 = arith.constant 0 : index
    %c0_4 = arith.constant 0 : index
    %2 = vector.load %arg3[%c0_3, %c0_4] : memref<2x1xf32, #tpu.memory_space<vmem>>, vector<2x1xf32>
    %cst = arith.constant dense<0xFF800000> : vector<8xf32>
    %3 = vector.multi_reduction <maximumf>, %0, %cst [0] : vector<2x8xf32> to vector<8xf32>
    %4 = vector.shape_cast %3 : vector<8xf32> to vector<1x8xf32>
    %5 = vector.broadcast %4 : vector<1x8xf32> to vector<2x8xf32>
    %6 = arith.subf %0, %5 : vector<2x8xf32>
    %7 = math.exp %6 : vector<2x8xf32>
    %cst_5 = arith.constant dense<0.000000e+00> : vector<8xf32>
    %8 = vector.multi_reduction <add>, %7, %cst_5 [0] : vector<2x8xf32> to vector<8xf32>
    %9 = vector.shape_cast %8 : vector<8xf32> to vector<1x8xf32>
    %10 = math.log %9 : vector<1x8xf32>
    %11 = vector.broadcast %10 : vector<1x8xf32> to vector<2x8xf32>
    %12 = arith.subf %6, %11 : vector<2x8xf32>
    %c0_i32 = arith.constant 0 : i32
    %13 = vector.broadcast %c0_i32 : i32 to vector<1x8xi32>
    %14 = arith.cmpi eq, %1, %13 : vector<1x8xi32>
    %15 = vector.extract_strided_slice %12 {offsets = [0, 0], sizes = [1, 8], strides = [1, 1]} : vector<2x8xf32> to vector<1x8xf32>
    %16 = vector.extract_strided_slice %12 {offsets = [1, 0], sizes = [1, 8], strides = [1, 1]} : vector<2x8xf32> to vector<1x8xf32>
    %17 = arith.select %14, %15, %16 : vector<1x8xi1>, vector<1x8xf32>
    %cst_6 = arith.constant 0.000000e+00 : f32
    %18 = vector.broadcast %cst_6 : f32 to vector<1x8xf32>
    %19 = arith.subf %18, %17 : vector<1x8xf32>
    %20 = vector.extract_strided_slice %2 {offsets = [0, 0], sizes = [1, 1], strides = [1, 1]} : vector<2x1xf32> to vector<1x1xf32>
    %21 = vector.extract_strided_slice %2 {offsets = [1, 0], sizes = [1, 1], strides = [1, 1]} : vector<2x1xf32> to vector<1x1xf32>
    %22 = vector.shape_cast %20 : vector<1x1xf32> to vector<1x1xf32>
    %23 = vector.broadcast %22 : vector<1x1xf32> to vector<1x8xf32>
    %24 = vector.shape_cast %21 : vector<1x1xf32> to vector<1x1xf32>
    %25 = vector.broadcast %24 : vector<1x1xf32> to vector<1x8xf32>
    %26 = arith.select %14, %23, %25 : vector<1x8xi1>, vector<1x8xf32>
    %27 = tpu.iota {dimensions = array<i32: 1>} : vector<1x8xi32>
    %c8_i32 = arith.constant 8 : i32
    %28 = arith.muli %arg0, %c8_i32 : i32
    %29 = vector.broadcast %28 : i32 to vector<1x8xi32>
    %30 = arith.addi %29, %27 : vector<1x8xi32>
    %c8_i32_7 = arith.constant 8 : i32
    %31 = vector.broadcast %c8_i32_7 : i32 to vector<1x8xi32>
    %32 = arith.cmpi slt, %30, %31 : vector<1x8xi32>
    %33 = arith.mulf %26, %19 : vector<1x8xf32>
    %cst_8 = arith.constant 0.000000e+00 : f32
    %34 = vector.broadcast %cst_8 : f32 to vector<1x8xf32>
    %35 = arith.select %32, %33, %34 : vector<1x8xi1>, vector<1x8xf32>
    %36 = vector.shape_cast %35 : vector<1x8xf32> to vector<1x1x8xf32>
    %cst_9 = arith.constant dense<0.000000e+00> : vector<1xf32>
    %37 = vector.multi_reduction <add>, %36, %cst_9 [1, 2] : vector<1x1x8xf32> to vector<1xf32>
    %38 = vector.shape_cast %37 : vector<1xf32> to vector<1x1x1xf32>
    %39 = vector.extract %38[0, 0, 0] : f32 from vector<1x1x1xf32>
    %cst_10 = arith.constant 0.000000e+00 : f32
    %40 = vector.broadcast %cst_10 : f32 to vector<1x8xf32>
    %41 = arith.select %32, %26, %40 : vector<1x8xi1>, vector<1x8xf32>
    %42 = vector.shape_cast %41 : vector<1x8xf32> to vector<1x1x8xf32>
    %cst_11 = arith.constant dense<0.000000e+00> : vector<1xf32>
    %43 = vector.multi_reduction <add>, %42, %cst_11 [1, 2] : vector<1x1x8xf32> to vector<1xf32>
    %44 = vector.shape_cast %43 : vector<1xf32> to vector<1x1x1xf32>
    %45 = vector.extract %44[0, 0, 0] : f32 from vector<1x1x1xf32>
    %46 = tpu.iota {dimensions = array<i32: 2>} : vector<1x1x128xi32>
    %c0_i32_12 = arith.constant 0 : i32
    %47 = vector.broadcast %c0_i32_12 : i32 to vector<1x1x128xi32>
    %48 = arith.cmpi eq, %46, %47 : vector<1x1x128xi32>
    %c1_i32 = arith.constant 1 : i32
    %49 = vector.broadcast %c1_i32 : i32 to vector<1x1x128xi32>
    %50 = arith.cmpi eq, %46, %49 : vector<1x1x128xi32>
    %cst_13 = arith.constant 0.000000e+00 : f32
    %51 = vector.broadcast %45 : f32 to vector<1x1x128xf32>
    %52 = vector.broadcast %cst_13 : f32 to vector<1x1x128xf32>
    %53 = arith.select %50, %51, %52 : vector<1x1x128xi1>, vector<1x1x128xf32>
    %54 = vector.broadcast %39 : f32 to vector<1x1x128xf32>
    %55 = arith.select %48, %54, %53 : vector<1x1x128xi1>, vector<1x1x128xf32>
    %c0_14 = arith.constant 0 : index
    %c0_15 = arith.constant 0 : index
    %c0_16 = arith.constant 0 : index
    %56 = vector.load %arg4[%c0_14, %c0_15, %c0_16] : memref<1x1x128xf32, #tpu.memory_space<vmem>>, vector<1x1x128xf32>
    tpu.vector_store %arg4[%c0_14, %c0_15, %c0_16], %55 {strides = array<i32>} : memref<1x1x128xf32, #tpu.memory_space<vmem>>, vector<1x1x128xf32>,
    return
  }
  func.func @transform_0(%arg0: i32) -> (i32, i32) {
    %c0_i32 = arith.constant 0 : i32
    %c0_i32_0 = arith.constant 0 : i32
    return %c0_i32, %arg0 : i32, i32
  }
  func.func @transform_1(%arg0: i32) -> (i32, i32) {
    %c0_i32 = arith.constant 0 : i32
    %c0_i32_0 = arith.constant 0 : i32
    return %c0_i32, %arg0 : i32, i32
  }
  func.func @transform_2(%arg0: i32) -> (i32, i32) {
    %c0_i32 = arith.constant 0 : i32
    %c0_i32_0 = arith.constant 0 : i32
    %c0_i32_1 = arith.constant 0 : i32
    return %c0_i32, %c0_i32_0 : i32, i32
  }
  func.func @transform_3(%arg0: i32) -> (i32, i32, i32) {
    %c0_i32 = arith.constant 0 : i32
    %c0_i32_0 = arith.constant 0 : i32
    %c0_i32_1 = arith.constant 0 : i32
    return %arg0, %c0_i32, %c0_i32_0 : i32, i32, i32
  }
}

</mosaic_0001>

<bundles_post_ra>
// kernel: tpu_custom_call.1
= control target key start
LH: loop header
LB: loop body
LE: loop exit
PB: predicated region body
PF: predicated region fallthrough
CT: control target
= control target key end

     0   :  { %v155_v1 = vmov 0   ;;  %s190_s0 = inlined_call_operand.vmem [shape: f32[2,8], index: 0, kind: input, shape index: {}]   ;;  %s191_s1 = inlined_call_operand.vmem [shape: s32[1,8], index: 1, kind: input, shape index: {}]   ;;  %s192_s2 = inlined_call_operand.vmem [shape: f32[2,1], index: 2, kind: input, shape index: {}]   ;;  %s193_s3 = inlined_call_operand.hbm [shape: f32[1,1,128], index: 3, kind: output, shape index: {}]  }
   0x1   :  { %v17_v0 = vld [vmem:[%s192_s2] sm:$0x3]  ;;  %128 = vset.pattern.permute.xlu0 %v155_v1 }
   0x2   :  { %61 = vperm.xlu0 %128, %v17_v0  }
   0x3   :  { %8 = vsyncpa [#allocation3], 0  ;;  %vm18_vm0 = vcmask 58368   ;;  %v15_v2 = vld [vmem:[%s190_s0] sm:$0x3]  ;;  %v44_v22 = vlaneseq  ;;  %vm78_vm3 = vcmask 57344  }
   0x4   :  { %v19_v3 = vsel %vm18_vm0, %v15_v2, -inf  ;;  %v156_v20 = vmov 1966171168   ;;  %v16_v31 = vld [vmem:[%s191_s1] sm:$0x1]  ;;  %s157_s16 = smov [#allocation2]  }
   0x5   :  { %v20_v4 = vrot.slane %v19_v3, 4  ;;  %v42_v21 = vunpack.c.l.s4 %v156_v20  ;;  %v45_v25 = vshrl.u32 %v44_v22, 7  ;;  %vm39_vm1 = vcmp.eq.s32.totalorder %v16_v31, 0  ;;  %s113_s17 = sshll.u32 %s157_s16, 4  ;;  %s114_s17 = int_to_ptr.vmem [resolvable:$true] %s113_s17 }
   0x6   :  { %v71_v34 = vand.u32 127, %v44_v22  ;;  %s133_s19 = scalar_lea.vmem %s114_s17, 16  ;;  %s137_s20 = scalar_lea.vmem %s114_s17, 32 }
   0x7   :  { %v21_v5 = vmax.f32 %v19_v3, %v20_v4  ;;  %v43_v24 = vunpack.c.0.s8 %v42_v21  ;;  %v66_v33 = vsub.s32 1, %v45_v25  ;;  %p134_p0 = scmp.ne.s32.totalorder %s114_s17, %s133_s19  ;;  %p138_p1 = scmp.lt.s32.totalorder %s114_s17, %s114_s17 }
   0x8   :  { %vm75_vm2 = vcmp.lt.s32.totalorder %v71_v34, 8  ;;  %vm101_vm4 = vcmp.eq.s32.totalorder %v71_v34, 1  ;;  %vm100_vm5 = vcmp.eq.s32.totalorder %v71_v34, 0  ;;  %p139_p2 = scmp.lt.s32.totalorder %s137_s20, %s133_s19 }
   0x9   :  { %v22_v6 = vrot.slane %v21_v5, 2  ;;  %v46_v27 = vsub.s32 %v43_v24, %v45_v25 }
   0xa   :  { %p140_p3 = por %p139_p2, %p138_p1 }
   0xb   :  { %v23_v7 = vmax.f32 %v21_v5, %v22_v6 }
   0xc   :  { %p141_p4 = pnand %p140_p3, %p134_p0 }
   0xd   :  { %v24_v8 = vrot.slane %v23_v7, 1 }
   0xf   :  { %v25_v9 = vmax.f32 %v23_v7, %v24_v8 }
  0x11   :  { %v26_v10 = vsub.f32 %v15_v2, %v25_v9 }
  0x13   :  { %v27_v11 = vmul.f32 1.442695, %v26_v10 }
  0x15   :  { %129 = vpow2.f32 %v27_v11 }
  0x22   :  { %v130_v12 = vpop.eup %129 }
  0x23   :  { %v29_v13 = vsel %vm18_vm0, %v130_v12, 0.0 }
  0x24   :  { %v30_v14 = vrot.slane %v29_v13, 4 }
  0x26   :  { %v31_v15 = vadd.f32 %v30_v14, %v29_v13 }
  0x28   :  { %v32_v16 = vrot.slane %v31_v15, 2 }
  0x2a   :  { %v33_v17 = vadd.f32 %v32_v16, %v31_v15 }
  0x2c   :  { %v34_v18 = vrot.slane %v33_v17, 1 }
  0x2e   :  { %v35_v19 = vadd.f32 %v34_v18, %v33_v17 }
  0x30   :  { %131 = vlog2.f32 %v35_v19 }
  0x3d   :  { %v132_v23 = vpop.eup %131 }
  0x3e   :  { %v37_v26 = vmul.f32 0.6931472, %v132_v23 }
  0x40   :  { %v38_v28 = vsub.f32 %v26_v10, %v37_v26 }
  0x42   :  { %v47_v29 = vrot.slane %v38_v28, %v46_v27 }
  0x44   :  { %v48_v30 = vcombine.high %v47_v29, %v47_v29 }
  0x46   :  { %v55_v32 = vrot.slane %v48_v30, %v46_v27 }
  0x48   :  { %v57_v35 = vsel %vm39_vm1, %v38_v28, %v55_v32 }
  0x49   :  { %v58_v37 = vsub.f32 0.0, %v57_v35 }
  0x7d   :  { %v62_v36 = vpop.permute.xlu0 %61 }
  0x7e   :  { %v67_v38 = vrot.slane %v62_v36, %v66_v33 }
  0x80   :  { %v69_v39 = vsel %vm39_vm1, %v62_v36, %v67_v38 }
  0x81   :  { %v89_v40 = vsel %vm75_vm2, %v69_v39, 0.0  ;;  %v76_v41 = vmul.f32 %v69_v39, %v58_v37 }
  0x82   :  { %v90_v42 = vsel %vm78_vm3, %v89_v40, 0.0 }
  0x83   :  { %91 = vadd.xlane.f32.xlu1 %v90_v42  ;;  %v77_v43 = vsel %vm75_vm2, %v76_v41, 0.0 }
  0x84   :  { %v79_v44 = vsel %vm78_vm3, %v77_v43, 0.0 }
  0x85   :  { %80 = vadd.xlane.f32.xlu0 %v79_v44 }
 0x10c   :  { %v92_v45 = vpop.xlane.xlu1 %91 }
 0x10d   :  { %v93_v46 = vrot.slane %v92_v45, 4 }
 0x10e   :  { %v81_v47 = vpop.xlane.xlu0 %80 }
 0x10f   :  { %v94_v48 = vadd.f32 %v93_v46, %v92_v45  ;;  %v82_v49 = vrot.slane %v81_v47, 4 }
 0x111   :  { %v95_v50 = vrot.slane %v94_v48, 2  ;;  %v83_v51 = vadd.f32 %v82_v49, %v81_v47 }
 0x113   :  { %v96_v52 = vadd.f32 %v95_v50, %v94_v48  ;;  %v84_v53 = vrot.slane %v83_v51, 2 }
 0x115   :  { %v85_v54 = vadd.f32 %v84_v53, %v83_v51  ;;  %v97_v55 = vrot.slane %v96_v52, 1 }
 0x117   :  { %v86_v56 = vrot.slane %v85_v54, 1  ;;  %v98_v58 = vadd.f32 %v97_v55, %v96_v52 }
 0x119   :  { %v87_v57 = vadd.f32 %v86_v56, %v85_v54 }
 0x11b   :  { %121 = vpush %v87_v57 }
 0x11c   :  { %123 = vpush %v98_v58 }
 0x14c   :  { %s122_s1 = spop %121 }
 0x14d   :  { %v104_v59 = vstv %s122_s1  ;;  %s124_s18 = spop %123 }
 0x14e   :  { %v102_v60 = vstv %s124_s18 }
 0x14f   :  { %v103_v61 = vsel %vm101_vm4, %v102_v60, 0.0 }
 0x150   :  { %v105_v62 = vsel %vm100_vm5, %v104_v59, %v103_v61 }
 0x151   :  { %106 = vst [vmem:[#allocation2] sm:$0x1] %v105_v62 }
 0x152   :  { %144 = shalt.err (!%p141_p4)
}
 0x153   :  { %116 = dma.vmem_to_hbm [thread:$0]  %s114_s17, 16, %s193_s3, [#allocation3]  }
 0x154   :  { %153 = dma.done.wait [#allocation3], 16  }
 0x155   :  { %154 = vsyncadd [#allocation3], 4294967280 }
 0x156   :  { %120 = vsyncpa [#allocation3], 1 }

</bundles_post_ra>
